<compile_context>
chip_gen: v7x
topology: tpu7x:2x2x1
jax: 0.10.0
libtpu: 0.0.40
codegen_flags: <defaults>
</compile_context>

<pallas_src>
import functools

import jax
import jax.numpy as jnp
from jax import lax
from jax.experimental import pallas as pl
from jax.experimental.pallas import tpu as pltpu

LANES = 128


def _l2_kernel(x_ref, o_ref, acc_ref, *, tile_rows, ch_rows, acc_rows):
    t = pl.program_id(1)  # reduction axis ("arbitrary"); axis 0 is the core axis

    @pl.when(t == 0)
    def _():
        acc_ref[...] = jnp.zeros_like(acc_ref)

    n_chunks = tile_rows // ch_rows
    folds = ch_rows // acc_rows

    def chunk(c, carry):
        start = pl.multiple_of(c * ch_rows, ch_rows)
        xc = x_ref[pl.ds(start, ch_rows), :].astype(jnp.float32)
        xx = xc * xc
        # Sublane-major reshape is layout-preserving; the axis-0 sum is pure
        # VPU adds into the resident (acc_rows, 128) f32 accumulator, so no
        # per-step cross-lane XLU reduce and no long serial add chain.
        acc_ref[...] += jnp.sum(xx.reshape(folds, acc_rows, LANES), axis=0)
        return carry

    lax.fori_loop(0, n_chunks, chunk, 0, unroll=n_chunks <= 8)

    @pl.when(t == pl.num_programs(1) - 1)
    def _():
        # Single cross-lane/sublane XLU reduce + scalar SMEM store per core.
        o_ref[0, 0] = jnp.sum(acc_ref[...])


def l2_reg_loss(x, *, block_bytes=4 * 1024 * 1024):
    """sum(x ** 2) reduced to a float32 scalar via a Pallas TPU kernel."""
    flat = jnp.ravel(x)
    n = flat.shape[0]
    itemsize = jnp.dtype(x.dtype).itemsize
    # Packed-sublane minimum per dtype width: (8,128) f32, (16,128) bf16,
    # (32,128) int8/fp8.
    sub = {4: 8, 2: 16, 1: 32}.get(itemsize, 8)

    rows_avail = n // LANES
    if rows_avail < sub:
        # Smaller than one packed tile: not worth a kernel launch.
        return jnp.sum(jnp.square(flat.astype(jnp.float32)))

    # ---- static tile geometry: acc_rows | ch_rows | tile_rows, all multiples
    # of the packed-sublane quantum `sub`. -------------------------------
    target_rows = max(sub, block_bytes // (LANES * itemsize))
    ch_rows = min(1024, target_rows, rows_avail)
    ch_rows = (ch_rows // sub) * sub
    if ch_rows >= 32:
        ch_rows = (ch_rows // 32) * 32  # let the wide accumulator divide it
        acc_rows = 32
    else:
        acc_rows = ch_rows
    tile_rows = min(target_rows, rows_avail)
    tile_rows = max(ch_rows, (tile_rows // ch_rows) * ch_rows)

    tiles_total = rows_avail // tile_rows        # >= 1
    num_cores = 2 if tiles_total >= 2 else 1     # leading "parallel" axis (v7x)
    steps = tiles_total // num_cores             # per-core grid steps, >= 1

    rows_kernel = num_cores * steps * tile_rows
    m = rows_kernel * LANES

    # Remainder (< ~1 tile per core + a partial lane row) goes to plain JAX so
    # the kernel stays completely mask-free.
    tail_sum = (
        jnp.sum(jnp.square(flat[m:].astype(jnp.float32)))
        if m < n
        else jnp.float32(0.0)
    )

    # When n == m the slice is the whole array and the reshape is a free
    # bitcast -> no extra HBM traffic.
    # TODO(synk): for large ragged inputs the prefix slice may materialize an
    # extra HBM copy; switch to memory_space=pl.ANY + manual DMA if profiled.
    slab = flat[:m].reshape(rows_kernel, LANES)

    kernel = functools.partial(
        _l2_kernel, tile_rows=tile_rows, ch_rows=ch_rows, acc_rows=acc_rows
    )

    partials = pl.pallas_call(
        kernel,
        out_shape=jax.ShapeDtypeStruct((num_cores, 1), jnp.float32),
        grid_spec=pltpu.PrefetchScalarGridSpec(
            num_scalar_prefetch=0,
            grid=(num_cores, steps),
            in_specs=[
                pl.BlockSpec((tile_rows, LANES), lambda c, t: (c * steps + t, 0))
            ],
            out_specs=pl.BlockSpec(
                (1, 1), lambda c, t: (c, 0), memory_space=pltpu.SMEM
            ),
            scratch_shapes=[pltpu.VMEM((acc_rows, LANES), jnp.float32)],
        ),
        compiler_params=pltpu.CompilerParams(
            dimension_semantics=("parallel", "arbitrary"),
            vmem_limit_bytes=32 * 1024 * 1024,
        ),
        cost_estimate=pl.CostEstimate(
            flops=2 * m,
            transcendentals=0,
            bytes_accessed=m * itemsize + num_cores * 4,
        ),
    )(slab)

    return jnp.sum(partials) + tail_sum


if __name__ == "__main__":
    key = jax.random.PRNGKey(0)
    k0, k1, k2, k3 = jax.random.split(key, 4)

    def ref(x):
        return jnp.sum(x.astype(jnp.float32) ** 2)

    # Small shape consistent with the module.
    x0 = jax.random.normal(k0, (2, 4, 16, 16), dtype=jnp.float32)
    loss = jax.block_until_ready(l2_reg_loss(x0))
    assert jnp.allclose(loss, ref(x0), rtol=1e-5, atol=1e-5), (loss, ref(x0))

    extra_tests = [
        # Multi-tile: exercises the dual-core split and multi-step grid.
        jax.random.normal(k1, (64, 512, 128), dtype=jnp.float32),
        # Ragged size: exercises the plain-JAX tail path.
        jax.random.normal(k2, (3, 1000, 353), dtype=jnp.float32),
        # Narrow dtype: exercises the in-kernel cast / packed-sublane path.
        jax.random.normal(k3, (256, 4096), dtype=jnp.bfloat16),
    ]
    for xt in extra_tests:
        got = jax.block_until_ready(l2_reg_loss(xt))
        want = ref(xt)
        assert jnp.allclose(got, want, rtol=5e-5, atol=1e-3), (xt.shape, got, want)

    print("KERNEL_OK")
</pallas_src>

<mosaic_0001>
module attributes {stable_mosaic.version = 11 : i64} {
  func.func @_l2_kernel(%arg0: i32, %arg1: i32, %arg2: memref<16x128xf32, #tpu.memory_space<vmem>>, %arg3: memref<1x1xf32, #tpu.memory_space<smem>>, %arg4: memref<16x128xf32, #tpu.memory_space<vmem>>) attributes {dimension_semantics = [#tpu.dimension_semantics<parallel>, #tpu.dimension_semantics<arbitrary>], iteration_bounds = array<i64: 1, 1>, scalar_prefetch = 0 : i64, scratch_operands = 1 : i64, tpu.core_type = #tpu.core_type<tc>, window_params = [{transform_indices = @transform_0, window_bounds = array<i64: 16, 128>}, {transform_indices = @transform_1, window_bounds = array<i64: 1, 1>}]} {
    %c0_i32 = arith.constant 0 : i32
    %0 = arith.cmpi eq, %arg1, %c0_i32 : i32
    %1 = arith.extui %0 : i1 to i32
    %c0_i32_0 = arith.constant 0 : i32
    %2 = arith.cmpi ne, %1, %c0_i32_0 : i32
    scf.if %2 {
      %cst_8 = arith.constant 0.000000e+00 : f32
      %16 = vector.broadcast %cst_8 : f32 to vector<16x128xf32>
      %c0_9 = arith.constant 0 : index
      %c0_10 = arith.constant 0 : index
      %17 = vector.load %arg4[%c0_9, %c0_10] : memref<16x128xf32, #tpu.memory_space<vmem>>, vector<16x128xf32>
      tpu.vector_store %arg4[%c0_9, %c0_10], %16 {strides = array<i32>} : memref<16x128xf32, #tpu.memory_space<vmem>>, vector<16x128xf32>,
    } else {
    }
    %c0_i32_1 = arith.constant 0 : i32
    %c16_i32 = arith.constant 16 : i32
    %3 = arith.muli %c0_i32_1, %c16_i32 : i32
    %4 = tpu.assume_multiple %3, 16 : i32
    %5 = arith.index_cast %4 : i32 to index
    %c0 = arith.constant 0 : index
    %6 = vector.load %arg2[%5, %c0] : memref<16x128xf32, #tpu.memory_space<vmem>>, vector<16x128xf32>
    %7 = arith.mulf %6, %6 : vector<16x128xf32>
    %c0_2 = arith.constant 0 : index
    %c0_3 = arith.constant 0 : index
    %8 = vector.load %arg4[%c0_2, %c0_3] : memref<16x128xf32, #tpu.memory_space<vmem>>, vector<16x128xf32>
    %9 = vector.shape_cast %7 : vector<16x128xf32> to vector<1x16x128xf32>
    %cst = arith.constant dense<0.000000e+00> : vector<16x128xf32>
    %10 = vector.multi_reduction <add>, %9, %cst [0] : vector<1x16x128xf32> to vector<16x128xf32>
    %11 = arith.addf %8, %10 : vector<16x128xf32>
    %c0_4 = arith.constant 0 : index
    %c0_5 = arith.constant 0 : index
    %12 = vector.load %arg4[%c0_4, %c0_5] : memref<16x128xf32, #tpu.memory_space<vmem>>, vector<16x128xf32>
    tpu.vector_store %arg4[%c0_4, %c0_5], %11 {strides = array<i32>} : memref<16x128xf32, #tpu.memory_space<vmem>>, vector<16x128xf32>,
    %c1_i32 = arith.constant 1 : i32
    %c0_i32_6 = arith.constant 0 : i32
    %13 = arith.cmpi eq, %arg1, %c0_i32_6 : i32
    %14 = arith.extui %13 : i1 to i32
    %c0_i32_7 = arith.constant 0 : i32
    %15 = arith.cmpi ne, %14, %c0_i32_7 : i32
    scf.if %15 {
      %c0_8 = arith.constant 0 : index
      %c0_9 = arith.constant 0 : index
      %16 = vector.load %arg4[%c0_8, %c0_9] : memref<16x128xf32, #tpu.memory_space<vmem>>, vector<16x128xf32>
      %17 = vector.shape_cast %16 : vector<16x128xf32> to vector<1x16x128xf32>
      %cst_10 = arith.constant dense<0.000000e+00> : vector<1xf32>
      %18 = vector.multi_reduction <add>, %17, %cst_10 [1, 2] : vector<1x16x128xf32> to vector<1xf32>
      %19 = vector.shape_cast %18 : vector<1xf32> to vector<1x1x1xf32>
      %20 = vector.extract %19[0, 0, 0] : f32 from vector<1x1x1xf32>
      %c0_11 = arith.constant 0 : index
      %c0_12 = arith.constant 0 : index
      %21 = memref.load %arg3[%c0_11, %c0_12] : memref<1x1xf32, #tpu.memory_space<smem>>
      memref.store %20, %arg3[%c0_11, %c0_12] : memref<1x1xf32, #tpu.memory_space<smem>>
    } else {
    }
    return
  }
  func.func @transform_0(%arg0: i32, %arg1: i32) -> (i32, i32) {
    %c1_i32 = arith.constant 1 : i32
    %0 = arith.muli %arg0, %c1_i32 : i32
    %1 = arith.addi %0, %arg1 : i32
    %c0_i32 = arith.constant 0 : i32
    %c0_i32_0 = arith.constant 0 : i32
    return %1, %c0_i32 : i32, i32
  }
  func.func @transform_1(%arg0: i32, %arg1: i32) -> (i32, i32) {
    %c0_i32 = arith.constant 0 : i32
    %c0_i32_0 = arith.constant 0 : i32
    return %arg0, %c0_i32 : i32, i32
  }
}

</mosaic_0001>

<bundles_post_ra>
// kernel: tpu_custom_call.1
= control target key start
LH: loop header
LB: loop body
LE: loop exit
PB: predicated region body
PF: predicated region fallthrough
CT: control target
= control target key end

     0   :  { %6 = vsyncpa [#allocation4], 0  ;;  %s158_s0 = inlined_call_operand.hbm [shape: f32[16,128], index: 0, kind: input, shape index: {}]   ;;  %s159_s1 = inlined_call_operand.hbm [shape: f32[1,1], index: 1, kind: output, shape index: {}]  }
   0x1   :  { %7 = vsyncpa [#allocation5], 0  ;;  %s120_s6 = smov [#allocation3]   ;;  %s84_s10 = scalar_lea.hbm %s158_s0, 256 }
   0x2   :  { %s17_s7 = sshll.u32 %s120_s6, 4  ;;  %p85_p0 = scmp.ne.s32.totalorder %s158_s0, %s84_s10  ;;  %s18_s7 = int_to_ptr.vmem [resolvable:$true] %s17_s7 }
   0x3   :  { %p88_p1 = scmp.lt.u32.totalorder %s84_s10, %s158_s0 }
   0x5   :  { %p90_p2 = pnand %p88_p1, %p85_p0 }
   0x7   :  { %93 = shalt.err (!%p90_p2)
}
   0x8   :  { %s94_s15 = scalar_lea.vmem %s18_s7, 256  ;;  %p99_p4 = scmp.lt.s32.totalorder %s18_s7, %s18_s7 }
   0x9   :  { %p95_p3 = scmp.ne.s32.totalorder %s18_s7, %s94_s15  ;;  %p100_p5 = scmp.lt.s32.totalorder %s94_s15, %s94_s15 }
   0xb   :  { %p101_p6 = por %p100_p5, %p99_p4 }
   0xd   :  { %p102_p7 = pnand %p101_p6, %p95_p3 }
   0xf   :  { %105 = shalt.err (!%p102_p7)
}
  0x10   :  { %s121_s16 = smov 128   ;;  %s122_s17 = smov 8  }
  0x11   :  { %23 = dma.hbm_to_vmem [thread:$0]  %s158_s0, 256, %s18_s7, [#allocation4], %s121_s16, %s121_s16, %s122_s17  }
  0x12   :  { %116 = dma.done.wait [#allocation4], 256  }
  0x13   :  { %117 = vsyncadd [#allocation4], 4294967040  ;;  %v35_v0 = vld [vmem:[#allocation3] sm:$0xff]  ;;  %v36_v1 = vld [vmem:[#allocation3 + $0x8] sm:$0xff]  ;;  %s106_s22 = scalar_lea.hbm %s159_s1, 16 }
  0x14   :  { %v37_v2 = vmul.f32 %v35_v0, %v35_v0  ;;  %v38_v3 = vmul.f32 %v36_v1, %v36_v1  ;;  %p107_p8 = scmp.ne.s32.totalorder %s159_s1, %s106_s22  ;;  %p110_p9 = scmp.lt.u32.totalorder %s106_s22, %s159_s1 }
  0x16   :  { %v52_v4 = vadd.f32 %v38_v3, %v37_v2  ;;  %p112_p10 = pnand %p110_p9, %p107_p8 }
  0x18   :  { %53 = vadd.xlane.f32.xlu0 %v52_v4 }
  0xa5   :  { %v54_v5 = vpop.xlane.xlu0 %53 }
  0xa6   :  { %v55_v6 = vrot.slane %v54_v5, 4 }
  0xa8   :  { %v56_v7 = vadd.f32 %v55_v6, %v54_v5 }
  0xaa   :  { %v57_v8 = vrot.slane %v56_v7, 2 }
  0xac   :  { %v58_v9 = vadd.f32 %v57_v8, %v56_v7 }
  0xae   :  { %v59_v10 = vrot.slane %v58_v9, 1 }
  0xb0   :  { %v60_v11 = vadd.f32 %v59_v10, %v58_v9 }
  0xb2   :  { %78 = vpush %v60_v11 }
  0xe3   :  { %s79_s20 = spop %78 }
  0xe4   :  { %63 = sst [smem:[#allocation6]] %s79_s20 }
  0xe5   :  { %115 = shalt.err (!%p112_p10)
}
  0xe6   :  { %s123_s27 = smov [#allocation6]  }
  0xe7   :  { %71 = dma.smem_to_hbm %s123_s27, 16, %s159_s1, [#allocation5]  }
  0xe8   :  { %118 = dma.done.wait [#allocation5], 16  }
  0xe9   :  { %119 = vsyncadd [#allocation5], 4294967280 }
  0xea   :  { %75 = sfence }
  0xeb   :  { %76 = vsyncpa [#allocation4], 1 }
  0xec   :  { %77 = vsyncpa [#allocation5], 1 }

</bundles_post_ra>
